<compile_context>
chip_gen: v7x
topology: tpu7x:2x2x1
jax: 0.10.0
libtpu: 0.0.40
codegen_flags: <defaults>
</compile_context>

<pallas_src>
import functools

import jax
import jax.numpy as jnp
from jax import lax
from jax.experimental import pallas as pl
from jax.experimental.pallas import tpu as pltpu

BN_EPS = 1e-5
LEAKY_SLOPE = 0.2
USE_BF16_MXU = True                         # bf16 MXU operands, f32 accumulate
MXU_DTYPE = jnp.bfloat16 if USE_BF16_MXU else jnp.float32

DEFAULT_BATCH_TILE = 1024                   # streamed-path rows per grid step
FUSED_MAX_ROWS = 4096                       # fused path: whole batch in VMEM
FUSED_VMEM_LIMIT = 48 * 1024 * 1024         # safe under v7x 64 MiB physical
STREAM_VMEM_LIMIT = 32 * 1024 * 1024

# A @ B^T contraction (contract last dim of both operands)
_NT_DIMS = (((1,), (1,)), ((), ()))


def _round_up(n, m):
    return (n + m - 1) // m * m


def _leaky_relu(x):
    return jnp.where(x > 0, x, LEAKY_SLOPE * x)


def _mxu_cast(x):
    return x.astype(MXU_DTYPE)


def _bn_scale_shift(mean, var, gamma, beta):
    scale = gamma * lax.rsqrt(var + BN_EPS)        # rsqrt -> EUP (free slot)
    shift = beta - mean * scale
    return scale, shift


def _batch_mean_var(h, valid, true_b):
    """Exact two-pass batch stats (fused path; h is VMEM-resident)."""
    inv_b = 1.0 / float(true_b)
    hm = h if valid is None else jnp.where(valid, h, 0.0)
    mean = jnp.sum(hm, axis=0, keepdims=True) * inv_b
    d = h - mean
    if valid is not None:
        d = jnp.where(valid, d, 0.0)
    var = jnp.sum(d * d, axis=0, keepdims=True) * inv_b
    return mean, var


def _fold_bn_onepass(s, ss, gamma, beta, true_b):
    """One-pass stats from streamed sum / sum-of-squares accumulators.
    NOTE: E[x^2]-mean^2 can lose precision for huge batches (documented)."""
    inv_b = 1.0 / float(true_b)
    mean = s * inv_b
    var = jnp.maximum(ss * inv_b - mean * mean, 0.0)
    return _bn_scale_shift(mean, var, gamma, beta)


# =============================================================================
# Fused path: whole forward in one kernel, everything resident in VMEM.
# =============================================================================
def _fused_kernel(x_ref, w1_ref, b1_ref, g1_ref, be1_ref,
                  w2_ref, b2_ref, g2_ref, be2_ref, w3_ref, b3_ref,
                  o_ref, *, true_b, needs_mask):
    # ---- Linear(in, 512) + LeakyReLU ----------------------------------------
    h1 = jnp.dot(_mxu_cast(x_ref[...]), w1_ref[...],
                 preferred_element_type=jnp.float32) + b1_ref[...]
    h1 = _leaky_relu(h1)

    valid = None
    if needs_mask:   # static: only traced when the batch is actually padded
        valid = lax.broadcasted_iota(jnp.int32, (h1.shape[0], 1), 0) < true_b

    # ---- BatchNorm1d(512): two-pass stats, folded into Linear2 --------------
    mean1, var1 = _batch_mean_var(h1, valid, true_b)
    scale1, shift1 = _bn_scale_shift(mean1, var1, g1_ref[...], be1_ref[...])
    # TODO(synk): Dropout with dp_rate > 0 needs pltpu.prng_seed/prng_random_bits
    #             + inverted-dropout scaling here; dp_rate == 0 -> identity.

    # (h1*scale1 + shift1) @ W2^T == h1 @ (scale1*W2)^T + shift1 @ W2^T
    # w2_ref keeps PyTorch (64, 512) orientation -> scale1 broadcasts on lanes
    # and the contraction is a transposed-rhs (A @ B^T) MXU matmul.
    w2f = _mxu_cast(w2_ref[...] * scale1)                                  # (64, 512)
    b2f = lax.dot_general(shift1, w2_ref[...], _NT_DIMS,
                          preferred_element_type=jnp.float32) + b2_ref[...]  # (1, 64)
    h2 = lax.dot_general(_mxu_cast(h1), w2f, _NT_DIMS,
                         preferred_element_type=jnp.float32) + b2f
    h2 = _leaky_relu(h2)

    # ---- BatchNorm1d(64) folded into the (64 -> 1) head ---------------------
    mean2, var2 = _batch_mean_var(h2, valid, true_b)
    scale2, shift2 = _bn_scale_shift(mean2, var2, g2_ref[...], be2_ref[...])
    w3f = w3_ref[...] * scale2                                             # (1, 64)
    b3f = jnp.sum(shift2 * w3_ref[...], axis=-1, keepdims=True) + b3_ref[...]

    # head as (1,64) @ (b_pad,64)^T -> lane-dense (1, b_pad) logits
    logit = lax.dot_general(w3f, h2, _NT_DIMS,
                            preferred_element_type=jnp.float32) + b3f
    o_ref[...] = jax.nn.sigmoid(logit)


def _forward_fused(x, p, B):
    b_pad = _round_up(B, 8)
    if b_pad != B:
        x = jnp.pad(x, ((0, b_pad - B), (0, 0)))
    out = pl.pallas_call(
        functools.partial(_fused_kernel, true_b=B, needs_mask=(b_pad != B)),
        out_shape=jax.ShapeDtypeStruct((1, b_pad), jnp.float32),
        compiler_params=pltpu.CompilerParams(vmem_limit_bytes=FUSED_VMEM_LIMIT),
    )(x, p["w1t"], p["b1"], p["g1"], p["be1"],
      p["w2"], p["b2"], p["g2"], p["be2"], p["w3"], p["b3"])
    return out[0, :B].reshape(B, 1)


# =============================================================================
# Streamed fallback path: 3 batch-tiled stages (for very large batches).
# =============================================================================
def _accumulate_stats(h, s_ref, ss_ref, i, bt, true_b, needs_mask):
    if not needs_mask:                       # static: batch is tile-aligned
        s_ref[...] += jnp.sum(h, axis=0, keepdims=True)
        ss_ref[...] += jnp.sum(h * h, axis=0, keepdims=True)
        return

    last = pl.num_programs(0) - 1

    @pl.when(i < last)                       # full tiles: no mask VALU cost
    def _():
        s_ref[...] += jnp.sum(h, axis=0, keepdims=True)
        ss_ref[...] += jnp.sum(h * h, axis=0, keepdims=True)

    @pl.when(i == last)                      # only the final tile has padding
    def _():
        rows = i * bt + lax.broadcasted_iota(jnp.int32, (bt, 1), 0)
        hm = jnp.where(rows < true_b, h, 0.0)
        s_ref[...] += jnp.sum(hm, axis=0, keepdims=True)
        ss_ref[...] += jnp.sum(hm * hm, axis=0, keepdims=True)


def _stage1_kernel(x_ref, w1_ref, b1_ref, a1_ref, s_ref, ss_ref,
                   *, true_b, bt, needs_mask):
    i = pl.program_id(0)
    h = jnp.dot(_mxu_cast(x_ref[...]), w1_ref[...],
                preferred_element_type=jnp.float32) + b1_ref[...]
    h = _leaky_relu(h)
    a1_ref[...] = h.astype(a1_ref.dtype)     # bf16 intermediate -> half the HBM

    @pl.when(i == 0)
    def _():
        s_ref[...] = jnp.zeros_like(s_ref)
        ss_ref[...] = jnp.zeros_like(ss_ref)

    _accumulate_stats(h, s_ref, ss_ref, i, bt, true_b, needs_mask)


def _stage2_kernel(a1_ref, s1_ref, ss1_ref, g1_ref, be1_ref, w2_ref, b2_ref,
                   a2_ref, s_ref, ss_ref, w2f_scr, b2f_scr,
                   *, true_b, bt, needs_mask):
    i = pl.program_id(0)

    @pl.when(i == 0)
    def _():
        # Fold BN1 (stats from stage 1) into Linear2 ONCE, into VMEM scratch.
        scale1, shift1 = _fold_bn_onepass(s1_ref[...], ss1_ref[...],
                                          g1_ref[...], be1_ref[...], true_b)
        w2f_scr[...] = (w2_ref[...] * scale1).astype(w2f_scr.dtype)       # (64, 512)
        b2f_scr[...] = lax.dot_general(shift1, w2_ref[...], _NT_DIMS,
                                       preferred_element_type=jnp.float32) + b2_ref[...]
        s_ref[...] = jnp.zeros_like(s_ref)
        ss_ref[...] = jnp.zeros_like(ss_ref)
    # TODO(synk): Dropout with dp_rate > 0 would be applied here; identity now.

    # a1 (bf16) feeds the MXU directly against the BN1-folded weights.
    h2 = lax.dot_general(a1_ref[...], w2f_scr[...], _NT_DIMS,
                         preferred_element_type=jnp.float32) + b2f_scr[...]
    h2 = _leaky_relu(h2)
    a2_ref[...] = h2.astype(a2_ref.dtype)

    _accumulate_stats(h2, s_ref, ss_ref, i, bt, true_b, needs_mask)


def _stage3_kernel(a2_ref, s2_ref, ss2_ref, g2_ref, be2_ref, w3_ref, b3_ref,
                   o_ref, *, true_b):
    i = pl.program_id(0)
    scale2, shift2 = _fold_bn_onepass(s2_ref[...], ss2_ref[...],
                                      g2_ref[...], be2_ref[...], true_b)
    # Fold BN2 into the head:  sigmoid(a2 @ (scale2*w3)^T + (shift2.w3 + b3))
    w3f = (w3_ref[...] * scale2).astype(a2_ref.dtype)                      # (1, 64)
    b3f = jnp.sum(shift2 * w3_ref[...], axis=-1, keepdims=True) + b3_ref[...]
    logit = lax.dot_general(w3f, a2_ref[...], _NT_DIMS,
                            preferred_element_type=jnp.float32) + b3f      # (1, bt)
    # Lane-dense write: row i of the resident (n_tiles, bt) output block.
    o_ref[pl.ds(i, 1), :] = jax.nn.sigmoid(logit)


def _forward_streamed(x, p, B, in_dim, H1, H2, batch_tile):
    bt = max(16, _round_up(batch_tile, 16))  # multiple of 16 for bf16 packing
    b_pad = _round_up(B, bt)
    n_tiles = b_pad // bt
    if b_pad != B:
        x = jnp.pad(x, ((0, b_pad - B), (0, 0)))
    needs_mask = (b_pad != B)

    resident = lambda r, c: pl.BlockSpec((r, c), lambda i: (0, 0))
    stream = lambda c: pl.BlockSpec((bt, c), lambda i: (i, 0))
    arb = pltpu.CompilerParams(dimension_semantics=("arbitrary",),
                               vmem_limit_bytes=STREAM_VMEM_LIMIT)

    # stage 1: Linear1 + LeakyReLU, bf16 a1 out, BN1 stat accumulation
    a1, s1, ss1 = pl.pallas_call(
        functools.partial(_stage1_kernel, true_b=B, bt=bt, needs_mask=needs_mask),
        grid=(n_tiles,),
        in_specs=[stream(in_dim), resident(in_dim, H1), resident(1, H1)],
        out_specs=[stream(H1), resident(1, H1), resident(1, H1)],
        out_shape=[jax.ShapeDtypeStruct((b_pad, H1), MXU_DTYPE),
                   jax.ShapeDtypeStruct((1, H1), jnp.float32),
                   jax.ShapeDtypeStruct((1, H1), jnp.float32)],
        compiler_params=arb,
    )(x, p["w1t"], p["b1"])

    # stage 2: BN1 folded into w2 (once), Linear2 + LeakyReLU, BN2 stats
    a2, s2, ss2 = pl.pallas_call(
        functools.partial(_stage2_kernel, true_b=B, bt=bt, needs_mask=needs_mask),
        grid=(n_tiles,),
        in_specs=[stream(H1), resident(1, H1), resident(1, H1),
                  resident(1, H1), resident(1, H1),
                  resident(H2, H1), resident(1, H2)],
        out_specs=[stream(H2), resident(1, H2), resident(1, H2)],
        out_shape=[jax.ShapeDtypeStruct((b_pad, H2), MXU_DTYPE),
                   jax.ShapeDtypeStruct((1, H2), jnp.float32),
                   jax.ShapeDtypeStruct((1, H2), jnp.float32)],
        scratch_shapes=[pltpu.VMEM((H2, H1), MXU_DTYPE),
                        pltpu.VMEM((1, H2), jnp.float32)],
        compiler_params=arb,
    )(a1, s1, ss1, p["g1"], p["be1"], p["w2"], p["b2"])

    # stage 3: BN2 folded into the head, sigmoid, lane-dense output rows
    out_rows = pl.pallas_call(
        functools.partial(_stage3_kernel, true_b=B),
        grid=(n_tiles,),
        in_specs=[stream(H2), resident(1, H2), resident(1, H2),
                  resident(1, H2), resident(1, H2),
                  resident(1, H2), resident(1, 1)],
        out_specs=pl.BlockSpec((n_tiles, bt), lambda i: (0, 0)),
        out_shape=jax.ShapeDtypeStruct((n_tiles, bt), jnp.float32),
        compiler_params=arb,
    )(a2, s2, ss2, p["g2"], p["be2"], p["w3"], p["b3"])

    return out_rows.reshape(b_pad, 1)[:B]


# =============================================================================
# Wrapper
# =============================================================================
def _prep_params(params):
    H1 = params["w1"].shape[0]
    H2 = params["w2"].shape[0]
    f32 = jnp.float32
    return dict(
        w1t=params["w1"].T.astype(MXU_DTYPE),            # (in_dim, 512)
        b1=params["b1"].reshape(1, H1).astype(f32),
        g1=params["g1"].reshape(1, H1).astype(f32),
        be1=params["be1"].reshape(1, H1).astype(f32),
        w2=params["w2"].astype(f32),                     # (64, 512) PyTorch layout
        b2=params["b2"].reshape(1, H2).astype(f32),
        g2=params["g2"].reshape(1, H2).astype(f32),
        be2=params["be2"].reshape(1, H2).astype(f32),
        w3=params["w3"].reshape(1, H2).astype(f32),
        b3=params["b3"].reshape(1, 1).astype(f32),
    )


def discriminator_forward(x, params, *, batch_tile=DEFAULT_BATCH_TILE,
                          fused_max_rows=FUSED_MAX_ROWS, force_streamed=False):
    x = x.astype(jnp.float32)
    B, in_dim = x.shape
    p = _prep_params(params)
    H1 = p["w1t"].shape[1]
    H2 = p["w2"].shape[0]

    if (not force_streamed) and _round_up(B, 8) <= fused_max_rows:
        return _forward_fused(x, p, B)
    return _forward_streamed(x, p, B, in_dim, H1, H2, batch_tile)


# =============================================================================
# Pure-JAX reference (PyTorch training-mode semantics) and param init
# =============================================================================
def discriminator_ref(x, params):
    h = x @ params["w1"].T + params["b1"]
    h = jnp.where(h > 0, h, LEAKY_SLOPE * h)
    m, v = jnp.mean(h, 0), jnp.var(h, 0)
    h = (h - m) / jnp.sqrt(v + BN_EPS) * params["g1"] + params["be1"]
    h = h @ params["w2"].T + params["b2"]
    h = jnp.where(h > 0, h, LEAKY_SLOPE * h)
    m, v = jnp.mean(h, 0), jnp.var(h, 0)
    h = (h - m) / jnp.sqrt(v + BN_EPS) * params["g2"] + params["be2"]
    h = h @ params["w3"].T + params["b3"]
    return jax.nn.sigmoid(h)


def init_params(key, model_input_dimension):
    ks = jax.random.split(key, 6)

    def linear(kw, kb, fan_in, fan_out):
        bound = 1.0 / jnp.sqrt(fan_in)
        w = jax.random.uniform(kw, (fan_out, fan_in), jnp.float32, -bound, bound)
        b = jax.random.uniform(kb, (fan_out,), jnp.float32, -bound, bound)
        return w, b

    w1, b1 = linear(ks[0], ks[1], model_input_dimension, 512)
    w2, b2 = linear(ks[2], ks[3], 512, 64)
    w3, b3 = linear(ks[4], ks[5], 64, 1)
    return dict(
        w1=w1, b1=b1,
        g1=jnp.ones((512,), jnp.float32), be1=jnp.zeros((512,), jnp.float32),
        w2=w2, b2=b2,
        g2=jnp.ones((64,), jnp.float32), be2=jnp.zeros((64,), jnp.float32),
        w3=w3, b3=b3,
    )


if __name__ == "__main__":
    key = jax.random.PRNGKey(0)
    k_x1, k_x2, k_x3, k_p = jax.random.split(key, 4)

    model_input_dimension = 32   # discriminator input feature dim
    dp_rate = 0.0                # dropout prob (identity)
    params = init_params(k_p, model_input_dimension)
    tol = 2e-2 if USE_BF16_MXU else 1e-5

    # 1) fused single-kernel path, tile-aligned batch
    B = 8
    x = jax.random.normal(k_x1, (B, model_input_dimension), jnp.float32)
    out = jax.block_until_ready(discriminator_forward(x, params))
    ref = discriminator_ref(x, params)
    assert out.shape == (B, 1), out.shape
    assert jnp.allclose(out, ref, atol=tol, rtol=tol), (out, ref)

    # 2) fused path with padded batch (masked BN stats)
    B = 6
    x = jax.random.normal(k_x2, (B, model_input_dimension), jnp.float32)
    out = jax.block_until_ready(discriminator_forward(x, params))
    ref = discriminator_ref(x, params)
    assert out.shape == (B, 1), out.shape
    assert jnp.allclose(out, ref, atol=tol, rtol=tol), (out, ref)

    # 3) streamed 3-stage fallback path (multi-tile, padded last tile)
    B = 300
    x = jax.random.normal(k_x3, (B, model_input_dimension), jnp.float32)
    out = jax.block_until_ready(
        discriminator_forward(x, params, batch_tile=128, force_streamed=True))
    ref = discriminator_ref(x, params)
    assert out.shape == (B, 1), out.shape
    assert jnp.allclose(out, ref, atol=tol, rtol=tol), (out, ref)

    print("KERNEL_OK")
</pallas_src>

<mosaic_0001>
module attributes {stable_mosaic.version = 11 : i64} {
  func.func @_fused_kernel(%arg0: memref<8x32xf32, #tpu.memory_space<vmem>>, %arg1: memref<32x512xbf16, #tpu.memory_space<vmem>>, %arg2: memref<1x512xf32, #tpu.memory_space<vmem>>, %arg3: memref<1x512xf32, #tpu.memory_space<vmem>>, %arg4: memref<1x512xf32, #tpu.memory_space<vmem>>, %arg5: memref<64x512xf32, #tpu.memory_space<vmem>>, %arg6: memref<1x64xf32, #tpu.memory_space<vmem>>, %arg7: memref<1x64xf32, #tpu.memory_space<vmem>>, %arg8: memref<1x64xf32, #tpu.memory_space<vmem>>, %arg9: memref<1x64xf32, #tpu.memory_space<vmem>>, %arg10: memref<1x1xf32, #tpu.memory_space<vmem>>, %arg11: memref<1x8xf32, #tpu.memory_space<vmem>>) attributes {dimension_semantics = [], scalar_prefetch = 0 : i64, scratch_operands = 0 : i64, tpu.core_type = #tpu.core_type<tc>} {
    %c0 = arith.constant 0 : index
    %c0_0 = arith.constant 0 : index
    %0 = vector.load %arg0[%c0, %c0_0] : memref<8x32xf32, #tpu.memory_space<vmem>>, vector<8x32xf32>
    %1 = arith.truncf %0 : vector<8x32xf32> to vector<8x32xbf16>
    %c0_1 = arith.constant 0 : index
    %c0_2 = arith.constant 0 : index
    %2 = vector.load %arg1[%c0_1, %c0_2] : memref<32x512xbf16, #tpu.memory_space<vmem>>, vector<32x512xbf16>
    %cst = arith.constant dense<0.000000e+00> : vector<8x512xf32>
    %3 = tpu.matmul %1, %2, %cst {dimension_numbers = #tpu.dot_dimension_numbers<[1], [0], [0], [1], [0, 0, 1, 1], [], []>} : vector<8x32xbf16>, vector<32x512xbf16>, vector<8x512xf32> -> vector<8x512xf32>
    %c0_3 = arith.constant 0 : index
    %c0_4 = arith.constant 0 : index
    %4 = vector.load %arg2[%c0_3, %c0_4] : memref<1x512xf32, #tpu.memory_space<vmem>>, vector<1x512xf32>
    %5 = vector.broadcast %4 : vector<1x512xf32> to vector<8x512xf32>
    %6 = arith.addf %3, %5 : vector<8x512xf32>
    %cst_5 = arith.constant 0.000000e+00 : f32
    %7 = vector.broadcast %cst_5 : f32 to vector<8x512xf32>
    %8 = arith.cmpf ogt, %6, %7 : vector<8x512xf32>
    %cst_6 = arith.constant 2.000000e-01 : f32
    %9 = vector.broadcast %cst_6 : f32 to vector<8x512xf32>
    %10 = arith.mulf %9, %6 : vector<8x512xf32>
    %11 = arith.select %8, %6, %10 : vector<8x512xi1>, vector<8x512xf32>
    %cst_7 = arith.constant dense<0.000000e+00> : vector<512xf32>
    %12 = vector.multi_reduction <add>, %11, %cst_7 [0] : vector<8x512xf32> to vector<512xf32>
    %13 = vector.shape_cast %12 : vector<512xf32> to vector<1x512xf32>
    %cst_8 = arith.constant 1.250000e-01 : f32
    %14 = vector.broadcast %cst_8 : f32 to vector<1x512xf32>
    %15 = arith.mulf %13, %14 : vector<1x512xf32>
    %16 = vector.broadcast %15 : vector<1x512xf32> to vector<8x512xf32>
    %17 = arith.subf %11, %16 : vector<8x512xf32>
    %18 = arith.mulf %17, %17 : vector<8x512xf32>
    %cst_9 = arith.constant dense<0.000000e+00> : vector<512xf32>
    %19 = vector.multi_reduction <add>, %18, %cst_9 [0] : vector<8x512xf32> to vector<512xf32>
    %20 = vector.shape_cast %19 : vector<512xf32> to vector<1x512xf32>
    %cst_10 = arith.constant 1.250000e-01 : f32
    %21 = vector.broadcast %cst_10 : f32 to vector<1x512xf32>
    %22 = arith.mulf %20, %21 : vector<1x512xf32>
    %c0_11 = arith.constant 0 : index
    %c0_12 = arith.constant 0 : index
    %23 = vector.load %arg3[%c0_11, %c0_12] : memref<1x512xf32, #tpu.memory_space<vmem>>, vector<1x512xf32>
    %c0_13 = arith.constant 0 : index
    %c0_14 = arith.constant 0 : index
    %24 = vector.load %arg4[%c0_13, %c0_14] : memref<1x512xf32, #tpu.memory_space<vmem>>, vector<1x512xf32>
    %cst_15 = arith.constant 9.99999974E-6 : f32
    %25 = vector.broadcast %cst_15 : f32 to vector<1x512xf32>
    %26 = arith.addf %22, %25 : vector<1x512xf32>
    %27 = math.rsqrt %26 : vector<1x512xf32>
    %28 = arith.mulf %23, %27 : vector<1x512xf32>
    %29 = arith.mulf %15, %28 : vector<1x512xf32>
    %30 = arith.subf %24, %29 : vector<1x512xf32>
    %c0_16 = arith.constant 0 : index
    %c0_17 = arith.constant 0 : index
    %31 = vector.load %arg5[%c0_16, %c0_17] : memref<64x512xf32, #tpu.memory_space<vmem>>, vector<64x512xf32>
    %32 = vector.broadcast %28 : vector<1x512xf32> to vector<64x512xf32>
    %33 = arith.mulf %31, %32 : vector<64x512xf32>
    %34 = arith.truncf %33 : vector<64x512xf32> to vector<64x512xbf16>
    %c0_18 = arith.constant 0 : index
    %c0_19 = arith.constant 0 : index
    %35 = vector.load %arg5[%c0_18, %c0_19] : memref<64x512xf32, #tpu.memory_space<vmem>>, vector<64x512xf32>
    %cst_20 = arith.constant dense<0.000000e+00> : vector<1x64xf32>
    %36 = tpu.matmul %30, %35, %cst_20 {dimension_numbers = #tpu.dot_dimension_numbers<[1], [1], [0], [0], [0, 0, 1, 0], [], []>} : vector<1x512xf32>, vector<64x512xf32>, vector<1x64xf32> -> vector<1x64xf32>
    %c0_21 = arith.constant 0 : index
    %c0_22 = arith.constant 0 : index
    %37 = vector.load %arg6[%c0_21, %c0_22] : memref<1x64xf32, #tpu.memory_space<vmem>>, vector<1x64xf32>
    %38 = arith.addf %36, %37 : vector<1x64xf32>
    %39 = arith.truncf %11 : vector<8x512xf32> to vector<8x512xbf16>
    %cst_23 = arith.constant dense<0.000000e+00> : vector<8x64xf32>
    %40 = tpu.matmul %39, %34, %cst_23 {dimension_numbers = #tpu.dot_dimension_numbers<[1], [1], [0], [0], [0, 0, 1, 0], [], []>} : vector<8x512xbf16>, vector<64x512xbf16>, vector<8x64xf32> -> vector<8x64xf32>
    %41 = vector.broadcast %38 : vector<1x64xf32> to vector<8x64xf32>
    %42 = arith.addf %40, %41 : vector<8x64xf32>
    %cst_24 = arith.constant 0.000000e+00 : f32
    %43 = vector.broadcast %cst_24 : f32 to vector<8x64xf32>
    %44 = arith.cmpf ogt, %42, %43 : vector<8x64xf32>
    %cst_25 = arith.constant 2.000000e-01 : f32
    %45 = vector.broadcast %cst_25 : f32 to vector<8x64xf32>
    %46 = arith.mulf %45, %42 : vector<8x64xf32>
    %47 = arith.select %44, %42, %46 : vector<8x64xi1>, vector<8x64xf32>
    %cst_26 = arith.constant dense<0.000000e+00> : vector<64xf32>
    %48 = vector.multi_reduction <add>, %47, %cst_26 [0] : vector<8x64xf32> to vector<64xf32>
    %49 = vector.shape_cast %48 : vector<64xf32> to vector<1x64xf32>
    %cst_27 = arith.constant 1.250000e-01 : f32
    %50 = vector.broadcast %cst_27 : f32 to vector<1x64xf32>
    %51 = arith.mulf %49, %50 : vector<1x64xf32>
    %52 = vector.broadcast %51 : vector<1x64xf32> to vector<8x64xf32>
    %53 = arith.subf %47, %52 : vector<8x64xf32>
    %54 = arith.mulf %53, %53 : vector<8x64xf32>
    %cst_28 = arith.constant dense<0.000000e+00> : vector<64xf32>
    %55 = vector.multi_reduction <add>, %54, %cst_28 [0] : vector<8x64xf32> to vector<64xf32>
    %56 = vector.shape_cast %55 : vector<64xf32> to vector<1x64xf32>
    %cst_29 = arith.constant 1.250000e-01 : f32
    %57 = vector.broadcast %cst_29 : f32 to vector<1x64xf32>
    %58 = arith.mulf %56, %57 : vector<1x64xf32>
    %c0_30 = arith.constant 0 : index
    %c0_31 = arith.constant 0 : index
    %59 = vector.load %arg7[%c0_30, %c0_31] : memref<1x64xf32, #tpu.memory_space<vmem>>, vector<1x64xf32>
    %c0_32 = arith.constant 0 : index
    %c0_33 = arith.constant 0 : index
    %60 = vector.load %arg8[%c0_32, %c0_33] : memref<1x64xf32, #tpu.memory_space<vmem>>, vector<1x64xf32>
    %cst_34 = arith.constant 9.99999974E-6 : f32
    %61 = vector.broadcast %cst_34 : f32 to vector<1x64xf32>
    %62 = arith.addf %58, %61 : vector<1x64xf32>
    %63 = math.rsqrt %62 : vector<1x64xf32>
    %64 = arith.mulf %59, %63 : vector<1x64xf32>
    %65 = arith.mulf %51, %64 : vector<1x64xf32>
    %66 = arith.subf %60, %65 : vector<1x64xf32>
    %c0_35 = arith.constant 0 : index
    %c0_36 = arith.constant 0 : index
    %67 = vector.load %arg9[%c0_35, %c0_36] : memref<1x64xf32, #tpu.memory_space<vmem>>, vector<1x64xf32>
    %68 = arith.mulf %67, %64 : vector<1x64xf32>
    %c0_37 = arith.constant 0 : index
    %c0_38 = arith.constant 0 : index
    %69 = vector.load %arg9[%c0_37, %c0_38] : memref<1x64xf32, #tpu.memory_space<vmem>>, vector<1x64xf32>
    %70 = arith.mulf %66, %69 : vector<1x64xf32>
    %cst_39 = arith.constant dense<0.000000e+00> : vector<1xf32>
    %71 = vector.multi_reduction <add>, %70, %cst_39 [1] : vector<1x64xf32> to vector<1xf32>
    %72 = vector.shape_cast %71 : vector<1xf32> to vector<1x1xf32>
    %c0_40 = arith.constant 0 : index
    %c0_41 = arith.constant 0 : index
    %73 = vector.load %arg10[%c0_40, %c0_41] : memref<1x1xf32, #tpu.memory_space<vmem>>, vector<1x1xf32>
    %74 = arith.addf %72, %73 : vector<1x1xf32>
    %cst_42 = arith.constant dense<0.000000e+00> : vector<1x8xf32>
    %75 = tpu.matmul %68, %47, %cst_42 {dimension_numbers = #tpu.dot_dimension_numbers<[1], [1], [0], [0], [0, 0, 1, 0], [], []>} : vector<1x64xf32>, vector<8x64xf32>, vector<1x8xf32> -> vector<1x8xf32>
    %76 = vector.broadcast %74 : vector<1x1xf32> to vector<1x8xf32>
    %77 = arith.addf %75, %76 : vector<1x8xf32>
    %78 = arith.negf %77 : vector<1x8xf32>
    %79 = math.exp %78 : vector<1x8xf32>
    %cst_43 = arith.constant 1.000000e+00 : f32
    %80 = vector.broadcast %cst_43 : f32 to vector<1x8xf32>
    %81 = arith.addf %80, %79 : vector<1x8xf32>
    %82 = arith.divf %80, %81 : vector<1x8xf32>
    %c0_44 = arith.constant 0 : index
    %c0_45 = arith.constant 0 : index
    %83 = vector.load %arg11[%c0_44, %c0_45] : memref<1x8xf32, #tpu.memory_space<vmem>>, vector<1x8xf32>
    tpu.vector_store %arg11[%c0_44, %c0_45], %82 {strides = array<i32>} : memref<1x8xf32, #tpu.memory_space<vmem>>, vector<1x8xf32>,
    return
  }
}

</mosaic_0001>

<bundles_post_ra>
// kernel: tpu_custom_call.1
= control target key start
LH: loop header
LB: loop body
LE: loop exit
PB: predicated region body
PF: predicated region fallthrough
CT: control target
= control target key end

     0   :  { %s1389_s0 = inlined_call_operand.hbm [shape: f32[8,32], index: 0, kind: input, shape index: {}]   ;;  %s1390_s1 = inlined_call_operand.hbm [shape: bf16[32,512], index: 1, kind: input, shape index: {}]   ;;  %s1391_s2 = inlined_call_operand.vmem [shape: f32[1,512], index: 2, kind: input, shape index: {}]   ;;  %s1392_s3 = inlined_call_operand.vmem [shape: f32[1,512], index: 3, kind: input, shape index: {}]   ;;  %s1393_s4 = inlined_call_operand.vmem [shape: f32[1,512], index: 4, kind: input, shape index: {}]   ;;  %s1394_s5 = inlined_call_operand.hbm [shape: f32[64,512], index: 5, kind: input, shape index: {}]   ;;  %s1395_s6 = inlined_call_operand.vmem [shape: f32[1,64], index: 6, kind: input, shape index: {}]   ;;  %s1396_s7 = inlined_call_operand.vmem [shape: f32[1,64], index: 7, kind: input, shape index: {}]   ;;  %s1397_s8 = inlined_call_operand.vmem [shape: f32[1,64], index: 8, kind: input, shape index: {}]   ;;  %s1398_s9 = inlined_call_operand.vmem [shape: f32[1,64], index: 9, kind: input, shape index: {}]   ;;  %s1399_s10 = inlined_call_operand.<no memory space> [shape: f32[1,1], index: 10, kind: input, shape index: {}]   ;;  %s1400_s11 = inlined_call_operand.hbm [shape: f32[1,8], index: 11, kind: output, shape index: {}]  }
   0x1   :  { %v16_v0 = vstv %s1399_s10 }
   0x2   :  { %17 = vst [vmem:[#allocation2] sm:$0x1] %v16_v0 }
   0x3   :  { %18 = vsyncpa [#allocation4], 0 }
   0x4   :  { %19 = vsyncpa [#allocation7], 0 }
   0x5   :  { %20 = vsyncpa [#allocation5], 0  ;;  %s1076_s19 = smov [#allocation6]   ;;  %s982_s23 = scalar_lea.hbm %s1390_s1, 1024 }
   0x6   :  { %s36_s20 = sshll.u32 %s1076_s19, 4  ;;  %p983_p0 = scmp.ne.s32.totalorder %s1390_s1, %s982_s23  ;;  %s37_s20 = int_to_ptr.vmem [resolvable:$true] %s36_s20 }
   0x7   :  { %p986_p1 = scmp.lt.u32.totalorder %s982_s23, %s1390_s1 }
   0x9   :  { %p988_p2 = pnand %p986_p1, %p983_p0 }
   0xb   :  { %991 = shalt.err (!%p988_p2)
}
   0xc   :  { %s992_s10 = scalar_lea.vmem %s37_s20, 1024  ;;  %p997_p4 = scmp.lt.s32.totalorder %s37_s20, %s37_s20 }
   0xd   :  { %p993_p3 = scmp.ne.s32.totalorder %s37_s20, %s992_s10  ;;  %p998_p5 = scmp.lt.s32.totalorder %s992_s10, %s992_s10 }
   0xf   :  { %p999_p6 = por %p998_p5, %p997_p4 }
  0x11   :  { %p1000_p7 = pnand %p999_p6, %p993_p3 }
  0x13   :  { %1003 = shalt.err (!%p1000_p7)
}
  0x14   :  { %s1077_s28 = smov 256   ;;  %s1078_s29 = smov 16  }
  0x15   :  { %42 = dma.hbm_to_vmem [thread:$0]  %s1390_s1, 1024, %s37_s20, [#allocation7], %s1077_s28, %s1077_s28, %s1078_s29  }
  0x16   :  { %s1079_s13 = smov [#allocation3]   ;;  %s1080_s15 = smov [#allocation8]  }
  0x17   :  { %s27_s14 = sshll.u32 %s1079_s13, 4  ;;  %s54_s16 = sshll.u32 %s1080_s15, 4  ;;  %s28_s14 = int_to_ptr.vmem [resolvable:$true] %s27_s14  ;;  %s55_s16 = int_to_ptr.vmem [resolvable:$true] %s54_s16 }
  0x18   :  { %s1004_s19 = scalar_lea.hbm %s1389_s0, 128 }
  0x19   :  { %p1005_p8 = scmp.ne.s32.totalorder %s1389_s0, %s1004_s19  ;;  %p1008_p9 = scmp.lt.u32.totalorder %s1004_s19, %s1389_s0 }
  0x1b   :  { %p1010_p10 = pnand %p1008_p9, %p1005_p8 }
  0x1d   :  { %1013 = shalt.err (!%p1010_p10)
}
  0x1e   :  { %s1014_s1 = scalar_lea.vmem %s28_s14, 128  ;;  %p1019_p12 = scmp.lt.s32.totalorder %s28_s14, %s28_s14 }
  0x1f   :  { %p1015_p11 = scmp.ne.s32.totalorder %s28_s14, %s1014_s1  ;;  %p1020_p13 = scmp.lt.s32.totalorder %s1014_s1, %s1014_s1 }
  0x21   :  { %p1021_p0 = por %p1020_p13, %p1019_p12 }
  0x23   :  { %p1022_p1 = pnand %p1021_p0, %p1015_p11 }
  0x25   :  { %1025 = shalt.err (!%p1022_p1)
}
  0x26   :  { %30 = dma.hbm_to_vmem [thread:$0]  %s1389_s0, 128, %s28_s14, [#allocation4]  }
  0x27   :  { %s1026_s10 = scalar_lea.hbm %s1394_s5, 4096 }
  0x28   :  { %p1027_p2 = scmp.ne.s32.totalorder %s1394_s5, %s1026_s10  ;;  %p1030_p3 = scmp.lt.u32.totalorder %s1026_s10, %s1394_s5 }
  0x2a   :  { %p1032_p4 = pnand %p1030_p3, %p1027_p2 }
  0x2c   :  { %1035 = shalt.err (!%p1032_p4)
}
  0x2d   :  { %s1036_s13 = scalar_lea.vmem %s55_s16, 4096  ;;  %p1041_p6 = scmp.lt.s32.totalorder %s55_s16, %s55_s16 }
  0x2e   :  { %p1037_p5 = scmp.ne.s32.totalorder %s55_s16, %s1036_s13  ;;  %p1042_p7 = scmp.lt.s32.totalorder %s1036_s13, %s1036_s13 }
  0x30   :  { %p1043_p8 = por %p1042_p7, %p1041_p6 }
  0x32   :  { %p1044_p9 = pnand %p1043_p8, %p1037_p5 }
  0x34   :  { %1047 = shalt.err (!%p1044_p9)
}
  0x35   :  { %s1081_s0 = smov 512   ;;  %s1082_s14 = smov 32  }
  0x36   :  { %60 = dma.hbm_to_vmem [thread:$0]  %s1394_s5, 4096, %s55_s16, [#allocation7], %s1081_s0, %s1081_s0, %s1082_s14  }
  0x37   :  { %1070 = dma.done.wait [#allocation4], 128  }
  0x38   :  { %1071 = vsyncadd [#allocation4], 4294967168 }
  0x39   :  { %1072 = dma.done.wait [#allocation7], 5120  }
  0x3a   :  { %1073 = vsyncadd [#allocation7], 4294962176  ;;  %v1083_v1 = vmov 0   ;;  %v956_v2 = vld [vmem:[#allocation6 + $0x4] ss:$16 sps:$4 sm:$0xff]   ;;  %v81_v10 = vld [vmem:[#allocation3] sm:$0xff]  ;;  %v93_v39 = vlaneseq }
  0x3b   :  { %189 = vmatprep.mubr.bf16.mxu0 %v1083_v1  ;;  %230 = vmatprep.mubr.bf16.mxu1 %v1083_v1  ;;  %v958_v3 = vld [vmem:[#allocation6 + $0xc] ss:$16 sps:$4 sm:$0xff]   ;;  %v960_v4 = vld [vmem:[#allocation6] ss:$16 sps:$4 sm:$0xff]   ;;  %v961_v5 = vld [vmem:[#allocation6 + $0x8] ss:$16 sps:$4 sm:$0xff]   ;;  %v82_v11 = vpack.c.bf16 %v81_v10, %v81_v10 }
  0x3c   :  { %955 = vset.pattern.permute.xlu0 %v1083_v1  ;;  %157 = vmatprep.subr.bf16.mxu0 %v956_v2  ;;  %v962_v6 = vld [vmem:[#allocation6 + $0x24] ss:$16 sps:$4 sm:$0xff]   ;;  %v964_v7 = vld [vmem:[#allocation6 + $0x2c] ss:$16 sps:$4 sm:$0xff]   ;;  %v966_v8 = vld [vmem:[#allocation6 + $0x20] ss:$16 sps:$4 sm:$0xff]  }
  0x3d   :  { %198 = vmatprep.subr.bf16.mxu1 %v958_v3  ;;  %158 = vmatpush1.bf16.msra.mxu0 %v960_v4  ;;  %v967_v9 = vld [vmem:[#allocation6 + $0x28] ss:$16 sps:$4 sm:$0xff]   ;;  %vm153_vm0 = vcmask 261120   ;;  %v1193_v15 = vld [vmem:[#allocation8] sm:$0xff]  ;;  %v1241_v40 = vshrl.u32 %v93_v39, 7  ;;  %vm1086_vm5 = vmmov 0  }
  0x3e   :  { %199 = vmatpush1.bf16.msra.mxu1 %v961_v5  ;;  %159 = vmatprep.subr.bf16.mxu0 %v962_v6  ;;  %v1187_v12 = vld [vmem:[#allocation8 + $0x8] sm:$0xff]  ;;  %v1195_v16 = vld [vmem:[#allocation8 + $0x20] sm:$0xff]  ;;  %v1235_v36 = vld [vmem:[#allocation8 + $0x18] sm:$0xff]  ;;  %vm743_vm7 = vcmask 523264   ;;  %vm772_vm8 = vcmask 516096   ;;  %vm865_vm9 = vcmask 57344  }
  0x3f   :  { %200 = vmatprep.subr.bf16.mxu1 %v964_v7  ;;  %v1189_v13 = vld [vmem:[#allocation8 + $0x28] sm:$0xff]  ;;  %v905_v17 = vpack.c.bf16 %v1195_v16, %v1193_v15  ;;  %v1205_v21 = vld [vmem:[#allocation8 + $0x40] sm:$0xff]  ;;  %v1237_v37 = vld [vmem:[#allocation8 + $0x38] sm:$0xff]  ;;  %v1244_v41 = vsub.s32 0, %v1241_v40  ;;  %v1247_v42 = vsub.s32 2, %v1241_v40  ;;  %v1253_v44 = vsub.s32 1, %v1241_v40 }
  0x40   :  { %v903_v14 = vpack.c.bf16 %v1189_v13, %v1187_v12  ;;  %v1199_v18 = vld [vmem:[#allocation8 + $0x48] sm:$0xff]  ;;  %v1207_v22 = vld [vmem:[#allocation8 + $0x60] sm:$0xff]  ;;  %v919_v38 = vpack.c.bf16 %v1237_v37, %v1235_v36  ;;  %v91_v43 = vld [vmem:[%s1391_s2] sm:$0xf]  ;;  %v1256_v45 = vsub.s32 3, %v1241_v40 }
  0x41   :  { %160 = vmatpush1.bf16.msra.mxu0 %v966_v8  ;;  %v1201_v19 = vld [vmem:[#allocation8 + $0x68] sm:$0xff]  ;;  %v909_v23 = vpack.c.bf16 %v1207_v22, %v1205_v21  ;;  %v1217_v27 = vld [vmem:[#allocation8 + $0x80] sm:$0xff]  ;;  %v96_v46 = vrot.slane %v91_v43, %v1244_v41  ;;  %v104_v47 = vrot.slane %v91_v43, %v1247_v42  ;;  %v100_v48 = vrot.slane %v91_v43, %v1253_v44 }
  0x42   :  { %201 = vmatpush1.bf16.msra.mxu1 %v967_v9  ;;  %904 = vmatprep.subr.bf16.mxu0 %v903_v14  ;;  %v907_v20 = vpack.c.bf16 %v1201_v19, %v1199_v18  ;;  %v1211_v24 = vld [vmem:[#allocation8 + $0x88] sm:$0xff]  ;;  %v1219_v28 = vld [vmem:[#allocation8 + $0xa0] sm:$0xff]  ;;  %v108_v49 = vrot.slane %v91_v43, %v1256_v45 }
  0x43   :  { %v1213_v25 = vld [vmem:[#allocation8 + $0xa8] sm:$0xff]  ;;  %v913_v29 = vpack.c.bf16 %v1219_v28, %v1217_v27  ;;  %v1229_v33 = vld [vmem:[#allocation8 + $0xc0] sm:$0xff] }
  0x44   :  { %891 = vmatmul.mubr.msk.bf16.vlgmr.msra.gmra.mrb[0].mxu0 %vm153_vm0, %v82_v11  ;;  %v911_v26 = vpack.c.bf16 %v1213_v25, %v1211_v24  ;;  %v1223_v30 = vld [vmem:[#allocation8 + $0xc8] sm:$0xff]  ;;  %v1231_v34 = vld [vmem:[#allocation8 + $0xe0] sm:$0xff] }
  0x45   :  { %892 = vmatmul.mubr.msk.bf16.vlgmr.msra.gmra.mrb[0].mxu1 %vm153_vm0, %v82_v11  ;;  %v1225_v31 = vld [vmem:[#allocation8 + $0xe8] sm:$0xff]  ;;  %v917_v35 = vpack.c.bf16 %v1231_v34, %v1229_v33 }
  0x46   :  { %v915_v32 = vpack.c.bf16 %v1225_v31, %v1223_v30 }
  0x4a   :  { %906 = vmatpush1.bf16.xpose.msra.mxu0 %v905_v17 }
  0x4b   :  { %908 = vmatprep.subr.bf16.mxu0 %v907_v20 }
  0x52   :  { %910 = vmatpush1.bf16.xpose.msra.mxu0 %v909_v23 }
  0x53   :  { %912 = vmatprep.subr.bf16.mxu0 %v911_v26 }
  0x5a   :  { %914 = vmatpush1.bf16.xpose.msra.mxu0 %v913_v29 }
  0x5b   :  { %916 = vmatprep.subr.bf16.mxu0 %v915_v32 }
  0x62   :  { %918 = vmatpush1.bf16.xpose.msra.mxu0 %v917_v35 }
  0x63   :  { %920 = vmatprep.subr.bf16.mxu0 %v919_v38 }
 0x117   :  { %v191_v50 = vpop.f32.mrb[0].mxu0 }
 0x118   :  { %v232_v51 = vpop.f32.mrb[0].mxu1  ;;  %v192_v52 = vadd.f32 %v191_v50, %v96_v46  ;;  %v193_v54 = vpop.f32.mrb[1].mxu0 }
 0x119   :  { %v233_v53 = vadd.f32 %v232_v51, %v104_v47  ;;  %v234_v55 = vpop.f32.mrb[1].mxu1  ;;  %v194_v56 = vadd.f32 %v193_v54, %v100_v48  ;;  %v195_v58 = vpop.f32.mrb[2].mxu0 }
 0x11a   :  { %v235_v57 = vadd.f32 %v234_v55, %v108_v49  ;;  %v236_v59 = vpop.f32.mrb[2].mxu1  ;;  %vm239_vm1 = vcmp.gt.f32.partialorder %v192_v52, 0.0  ;;  %v243_v60 = vmul.f32 0.2, %v192_v52  ;;  %v196_v2 = vpop.f32.mrb[3].mxu0 }
 0x11b   :  { %vm241_vm2 = vcmp.gt.f32.partialorder %v233_v53, 0.0  ;;  %v245_v61 = vmul.f32 0.2, %v233_v53  ;;  %vm240_vm3 = vcmp.gt.f32.partialorder %v194_v56, 0.0  ;;  %v244_v62 = vmul.f32 0.2, %v194_v56 }
 0x11c   :  { %vm242_vm4 = vcmp.gt.f32.partialorder %v235_v57, 0.0  ;;  %v246_v63 = vmul.f32 0.2, %v235_v57  ;;  %v1262_v0 = vsel %vm239_vm1, %v192_v52, %v243_v60  ;;  %v237_v3 = vpop.f32.mrb[3].mxu1 }
 0x11d   :  { %v1264_v1 = vsel %vm241_vm2, %v233_v53, %v245_v61  ;;  %v251_v4 = vrot.slane %v1262_v0, 4  ;;  %v248_v6 = vsel %vm240_vm3, %v194_v56, %v244_v62 }
 0x11e   :  { %v263_v5 = vrot.slane %v1264_v1, 4  ;;  %v1268_v7 = vsel %vm242_vm4, %v235_v57, %v246_v63  ;;  %v257_v8 = vrot.slane %v248_v6, 4  ;;  %v653_v10 = vpack.c.bf16 %v248_v6, %v248_v6 }
 0x11f   :  { %v269_v9 = vrot.slane %v1268_v7, 4  ;;  %v252_v11 = vadd.f32 %v251_v4, %v1262_v0 }
 0x120   :  { %v264_v14 = vadd.f32 %v263_v5, %v1264_v1  ;;  %v258_v17 = vadd.f32 %v257_v8, %v248_v6  ;;  %692 = vmatprep.mubr.bf16.mxu1 %v653_v10 }
 0x121   :  { %v270_v20 = vadd.f32 %v269_v9, %v1268_v7  ;;  %v253_v23 = vrot.slane %v252_v11, 2 }
 0x122   :  { %v265_v26 = vrot.slane %v264_v14, 2  ;;  %v259_v29 = vrot.slane %v258_v17, 2 }
 0x123   :  { %v271_v32 = vrot.slane %v270_v20, 2  ;;  %v254_v35 = vadd.f32 %v253_v23, %v252_v11 }
 0x124   :  { %v266_v38 = vadd.f32 %v265_v26, %v264_v14  ;;  %v260_v39 = vadd.f32 %v259_v29, %v258_v17 }
 0x125   :  { %v272_v43 = vadd.f32 %v271_v32, %v270_v20  ;;  %v255_v46 = vrot.slane %v254_v35, 1 }
 0x126   :  { %v267_v47 = vrot.slane %v266_v38, 1  ;;  %v261_v48 = vrot.slane %v260_v39, 1 }
 0x127   :  { %v273_v49 = vrot.slane %v272_v43, 1  ;;  %v256_v50 = vadd.f32 %v255_v46, %v254_v35 }
 0x128   :  { %v268_v51 = vadd.f32 %v267_v47, %v266_v38  ;;  %v262_v52 = vadd.f32 %v261_v48, %v260_v39 }
 0x129   :  { %v274_v53 = vadd.f32 %v273_v49, %v272_v43  ;;  %v1274_v54 = vmul.f32 0.125, %v256_v50 }
 0x12a   :  { %v1276_v55 = vmul.f32 0.125, %v268_v51  ;;  %v1278_v56 = vmul.f32 0.125, %v262_v52 }
 0x12b   :  { %v1280_v57 = vmul.f32 0.125, %v274_v53  ;;  %v279_v58 = vsub.f32 %v1262_v0, %v1274_v54 }
 0x12c   :  { %v281_v59 = vsub.f32 %v1264_v1, %v1276_v55  ;;  %v280_v60 = vsub.f32 %v248_v6, %v1278_v56 }
 0x12d   :  { %v282_v61 = vsub.f32 %v1268_v7, %v1280_v57  ;;  %v283_v62 = vmul.f32 %v279_v58, %v279_v58 }
 0x12e   :  { %v285_v63 = vmul.f32 %v281_v59, %v281_v59  ;;  %v284_v2 = vmul.f32 %v280_v60, %v280_v60 }
 0x12f   :  { %v286_v3 = vmul.f32 %v282_v61, %v282_v61  ;;  %v287_v4 = vrot.slane %v283_v62, 4 }
 0x130   :  { %v299_v5 = vrot.slane %v285_v63, 4  ;;  %v293_v8 = vrot.slane %v284_v2, 4 }
 0x131   :  { %v305_v9 = vrot.slane %v286_v3, 4  ;;  %v288_v10 = vadd.f32 %v287_v4, %v283_v62 }
 0x132   :  { %v300_v11 = vadd.f32 %v299_v5, %v285_v63  ;;  %v294_v14 = vadd.f32 %v293_v8, %v284_v2  ;;  %v1084_v2 = vmov 1966171168  }
 0x133   :  { %v306_v17 = vadd.f32 %v305_v9, %v286_v3  ;;  %v289_v20 = vrot.slane %v288_v10, 2  ;;  %v332_v3 = vunpack.c.l.s4 %v1084_v2 }
 0x134   :  { %v301_v23 = vrot.slane %v300_v11, 2  ;;  %v295_v26 = vrot.slane %v294_v14, 2 }
 0x135   :  { %v307_v29 = vrot.slane %v306_v17, 2  ;;  %v290_v6 = vadd.f32 %v289_v20, %v288_v10  ;;  %v333_v4 = vunpack.c.0.s8 %v332_v3 }
 0x136   :  { %v302_v32 = vadd.f32 %v301_v23, %v300_v11  ;;  %v296_v35 = vadd.f32 %v295_v26, %v294_v14 }
 0x137   :  { %v308_v38 = vadd.f32 %v307_v29, %v306_v17  ;;  %v291_v39 = vrot.slane %v290_v6, 1  ;;  %v336_v9 = vsub.s32 %v333_v4, %v1241_v40  ;;  %v315_v29 = vld [vmem:[%s1392_s3] sm:$0xf] }
 0x138   :  { %v303_v43 = vrot.slane %v302_v32, 1  ;;  %v297_v46 = vrot.slane %v296_v35, 1  ;;  %v412_v4 = vld [vmem:[#allocation8 + $0x10] sm:$0xff] }
 0x139   :  { %v309_v47 = vrot.slane %v308_v38, 1  ;;  %v292_v48 = vadd.f32 %v291_v39, %v290_v6 }
 0x13a   :  { %v304_v49 = vadd.f32 %v303_v43, %v302_v32  ;;  %v298_v50 = vadd.f32 %v297_v46, %v296_v35 }
 0x13b   :  { %v310_v51 = vadd.f32 %v309_v47, %v308_v38  ;;  %v311_v52 = vmul.f32 0.125, %v292_v48 }
 0x13c   :  { %v313_v53 = vmul.f32 0.125, %v304_v49  ;;  %v312_v58 = vmul.f32 0.125, %v298_v50 }
 0x13d   :  { %v314_v59 = vmul.f32 0.125, %v310_v51  ;;  %v317_v60 = vadd.f32 1e-05, %v311_v52 }
 0x13e   :  { %v319_v61 = vadd.f32 1e-05, %v313_v53  ;;  %v318_v62 = vadd.f32 1e-05, %v312_v58 }
 0x13f   :  { %v320_v63 = vadd.f32 1e-05, %v314_v59  ;;  %968 = vrsqrt.f32 %v317_v60 }
 0x140   :  { %970 = vrsqrt.f32 %v319_v61 }
 0x141   :  { %972 = vrsqrt.f32 %v318_v62 }
 0x142   :  { %974 = vrsqrt.f32 %v320_v63 }
 0x149   :  { %v969_v5 = vpop.eup %968 }
 0x14a   :  { %v971_v8 = vpop.eup %970 }
 0x14b   :  { %v973_v10 = vpop.eup %972 }
 0x14c   :  { %v975_v11 = vpop.eup %974  ;;  %v329_v14 = vcombine.low %v969_v5, %v973_v10  ;;  %v421_v10 = vld [vmem:[#allocation8 + $0x58] sm:$0xff] }
 0x14d   :  { %v330_v17 = vcombine.low %v971_v8, %v975_v11 }
 0x14e   :  { %v337_v20 = vrot.slane %v329_v14, %v336_v9 }
 0x14f   :  { %v344_v23 = vrot.slane %v330_v17, %v336_v9 }
 0x151   :  { %v345_v26 = vcombine.low %v337_v20, %v344_v23 }
 0x153   :  { %v352_v6 = vrot.slane %v345_v26, %v336_v9 }
 0x155   :  { %v354_v32 = vmul.f32 %v352_v6, %v315_v29  ;;  %v433_v6 = vld [vmem:[#allocation8 + $0xb8] sm:$0xff] }
 0x157   :  { %v359_v35 = vrot.slane %v354_v32, %v1244_v41  ;;  %v363_v38 = vrot.slane %v354_v32, %v1253_v44  ;;  %v1296_v39 = vrot.slane %v354_v32, %v1247_v42  ;;  %v1299_v40 = vrot.slane %v354_v32, %v1256_v45 }
 0x159   :  { %v378_v43 = vmul.f32 %v1296_v39, %v1276_v55  ;;  %v379_v46 = vmul.f32 %v1299_v40, %v1280_v57  ;;  %v443_v47 = vmul.f32 %v1187_v12, %v363_v38  ;;  %v447_v48 = vmul.f32 %v1189_v13, %v363_v38 }
 0x15a   :  { %v442_v49 = vmul.f32 %v1193_v15, %v359_v35  ;;  %v446_v50 = vmul.f32 %v1195_v16, %v359_v35  ;;  %v451_v51 = vmul.f32 %v1199_v18, %v363_v38  ;;  %v455_v52 = vmul.f32 %v1201_v19, %v363_v38 }
 0x15b   :  { %v385_v53 = vcombine.low %v378_v43, %v379_v46  ;;  %v475_v58 = vpack.c.bf16 %v447_v48, %v443_v47  ;;  %v376_v55 = vmul.f32 %v359_v35, %v1274_v54  ;;  %v377_v60 = vmul.f32 %v363_v38, %v1278_v56  ;;  %v316_v54 = vld [vmem:[%s1393_s4] sm:$0xf] }
 0x15c   :  { %v474_v59 = vpack.c.bf16 %v446_v50, %v442_v49  ;;  %v479_v57 = vpack.c.bf16 %v455_v52, %v451_v51  ;;  %v450_v15 = vmul.f32 %v1205_v21, %v359_v35  ;;  %v454_v16 = vmul.f32 %v1207_v22, %v359_v35  ;;  %v416_v21 = vld [vmem:[#allocation8 + $0x30] sm:$0xff]  ;;  %v437_v49 = vld [vmem:[#allocation8 + $0xd8] sm:$0xff] }
 0x15d   :  { %660 = vmatprep.subr.bf16.mxu1 %v475_v58  ;;  %v399_v12 = vrot.slane %v385_v53, %v336_v9  ;;  %v384_v13 = vcombine.low %v376_v55, %v377_v60  ;;  %v459_v19 = vmul.f32 %v1211_v24, %v363_v38  ;;  %v463_v61 = vmul.f32 %v1213_v25, %v363_v38  ;;  %v428_v47 = vld [vmem:[#allocation8 + $0x90] sm:$0xff]  ;;  %v441_v50 = vld [vmem:[#allocation8 + $0xf8] sm:$0xff] }
 0x15e   :  { %661 = vmatpush1.bf16.xpose.msra.mxu1 %v474_v59  ;;  %v478_v56 = vpack.c.bf16 %v454_v16, %v450_v15  ;;  %v921_v22 = vpack.c.bf16 %v416_v21, %v412_v4  ;;  %v458_v5 = vmul.f32 %v1217_v27, %v359_v35  ;;  %v462_v8 = vmul.f32 %v1219_v28, %v359_v35  ;;  %v420_v27 = vld [vmem:[#allocation8 + $0x50] sm:$0xff] }
 0x15f   :  { %662 = vmatprep.subr.bf16.mxu1 %v479_v57  ;;  %v392_v18 = vrot.slane %v384_v13, %v336_v9  ;;  %v483_v2 = vpack.c.bf16 %v463_v61, %v459_v19  ;;  %v467_v14 = vmul.f32 %v1223_v30, %v363_v38  ;;  %v471_v17 = vmul.f32 %v1225_v31, %v363_v38  ;;  %v424_v28 = vld [vmem:[#allocation8 + $0x70] sm:$0xff]  ;;  %v429_v31 = vld [vmem:[#allocation8 + $0x98] sm:$0xff] }
 0x160   :  { %v925_v26 = vpack.c.bf16 %v424_v28, %v420_v27  ;;  %v466_v29 = vmul.f32 %v1229_v33, %v359_v35  ;;  %v470_v30 = vmul.f32 %v1231_v34, %v359_v35  ;;  %v927_v32 = vpack.c.bf16 %v433_v6, %v429_v31  ;;  %v432_v48 = vld [vmem:[#allocation8 + $0xb0] sm:$0xff] }
 0x161   :  { %v400_v62 = vcombine.low %v392_v18, %v399_v12  ;;  %v487_v23 = vpack.c.bf16 %v471_v17, %v467_v14  ;;  %v449_v38 = vmul.f32 %v1237_v37, %v1299_v40  ;;  %v929_v33 = vpack.c.bf16 %v432_v48, %v428_v47  ;;  %v436_v55 = vld [vmem:[#allocation8 + $0xd0] sm:$0xff] }
 0x162   :  { %v486_v43 = vpack.c.bf16 %v470_v30, %v466_v29  ;;  %v444_v34 = vmul.f32 %v412_v4, %v1296_v39  ;;  %v448_v35 = vmul.f32 %v416_v21, %v1296_v39  ;;  %v931_v51 = vpack.c.bf16 %v441_v50, %v437_v49  ;;  %v440_v60 = vld [vmem:[#allocation8 + $0xf0] sm:$0xff] }
 0x163   :  { %v407_v63 = vrot.slane %v400_v62, %v336_v9  ;;  %v425_v9 = vld [vmem:[#allocation8 + $0x78] sm:$0xff]  ;;  %v652_v52 = vpack.c.bf16 %v1262_v0, %v1262_v0  ;;  %v655_v58 = vpack.c.bf16 %v1268_v7, %v1268_v7  ;;  %v933_v57 = vpack.c.bf16 %v440_v60, %v436_v55 }
 0x164   :  { %v923_v11 = vpack.c.bf16 %v425_v9, %v421_v10  ;;  %v457_v37 = vmul.f32 %v425_v9, %v1299_v40  ;;  %v476_v53 = vpack.c.bf16 %v448_v35, %v444_v34  ;;  %v452_v12 = vmul.f32 %v420_v27, %v1296_v39  ;;  %v769_v35 = vld [vmem:[%s1398_s9] sm:$0x1] }
 0x165   :  { %v1320_v3 = vsub.f32 %v316_v54, %v407_v63  ;;  %v456_v13 = vmul.f32 %v424_v28, %v1296_v39  ;;  %v461_v0 = vmul.f32 %v429_v31, %v1299_v40  ;;  %v465_v15 = vmul.f32 %v433_v6, %v1299_v40 }
 0x166   :  { %663 = vmatpush1.bf16.xpose.msra.mxu1 %v478_v56  ;;  %v460_v18 = vmul.f32 %v428_v47, %v1296_v39  ;;  %v464_v19 = vmul.f32 %v432_v48, %v1296_v39  ;;  %v469_v62 = vmul.f32 %v437_v49, %v1299_v40  ;;  %v473_v54 = vmul.f32 %v441_v50, %v1299_v40  ;;  %v763_v50 = vld [vmem:[%s1397_s8] sm:$0x1] }
 0x167   :  { %664 = vmatprep.subr.bf16.mxu1 %v483_v2  ;;  %v499_v24 = vrot.slane %v1320_v3, %v1253_v44  ;;  %v495_v25 = vrot.slane %v1320_v3, %v1244_v41  ;;  %v507_v20 = vrot.slane %v1320_v3, %v1256_v45  ;;  %v482_v44 = vpack.c.bf16 %v462_v8, %v458_v5 }
 0x168   :  { %v445_v45 = vmul.f32 %v1235_v36, %v1299_v40  ;;  %v453_v36 = vmul.f32 %v421_v10, %v1299_v40  ;;  %v480_v16 = vpack.c.bf16 %v456_v13, %v452_v12  ;;  %v485_v7 = vpack.c.bf16 %v465_v15, %v461_v0 }
 0x169   :  { %576 = vmatprep.mubr.f32.mxu0 %v499_v24  ;;  %v503_v61 = vrot.slane %v1320_v3, %v1247_v42  ;;  %v484_v56 = vpack.c.bf16 %v464_v19, %v460_v18  ;;  %v489_v63 = vpack.c.bf16 %v473_v54, %v469_v62  ;;  %v468_v2 = vmul.f32 %v436_v55, %v1296_v39  ;;  %v490_v24 = vld [vmem:[%s1395_s6] sm:$0x1] }
 0x16a   :  { %577 = vmatmul.mubr.f32.vlgmr.msra.gmra.mrb[4].mxu0 %v495_v25  ;;  %v477_v46 = vpack.c.bf16 %v449_v38, %v445_v45  ;;  %v481_v59 = vpack.c.bf16 %v457_v37, %v453_v36  ;;  %v472_v4 = vmul.f32 %v440_v60, %v1296_v39  ;;  %v1085_v42 = vmov 0.0  }
 0x16b   :  { %922 = vmatpush1.bf16.xpose.msra.mxu0 %v921_v22  ;;  %646 = vmatprep.mubr.f32.mxu0 %v507_v20  ;;  %v654_v22 = vpack.c.bf16 %v1264_v1, %v1264_v1 }
 0x16c   :  { %924 = vmatprep.subr.bf16.mxu0 %v923_v11  ;;  %v488_v21 = vpack.c.bf16 %v472_v4, %v468_v2 }
 0x16e   :  { %665 = vmatpush1.bf16.xpose.msra.mxu1 %v482_v44 }
 0x16f   :  { %666 = vmatprep.subr.bf16.mxu1 %v487_v23 }
 0x173   :  { %926 = vmatpush1.bf16.xpose.msra.mxu0 %v925_v26 }
 0x174   :  { %928 = vmatprep.subr.bf16.mxu0 %v927_v32 }
 0x176   :  { %667 = vmatpush1.bf16.xpose.msra.mxu1 %v486_v43 }
 0x177   :  { %700 = vmatprep.subr.bf16.mxu1 %v477_v46 }
 0x17b   :  { %930 = vmatpush1.bf16.xpose.msra.mxu0 %v929_v33  ;;  %v762_v33 = vld [vmem:[%s1396_s7] sm:$0x1]  ;;  %s1087_s7 = smov [#allocation9]  }
 0x17c   :  { %932 = vmatprep.subr.bf16.mxu0 %v931_v51  ;;  %s873_s8 = sshll.u32 %s1087_s7, 4  ;;  %s874_s8 = int_to_ptr.vmem [resolvable:$true] %s873_s8 }
 0x17d   :  { %693 = vmatmul.mubr.bf16.vlgmr.msra.gmra.mrb[4].mxu1 %v652_v52  ;;  %s1048_s9 = scalar_lea.vmem %s874_s8, 16  ;;  %s1052_s25 = scalar_lea.vmem %s874_s8, 32 }
 0x17e   :  { %701 = vmatpush1.bf16.xpose.msra.mxu1 %v476_v53  ;;  %732 = vmatprep.mubr.bf16.mxu1 %v655_v58  ;;  %v776_v58 = vld [vmem:[#allocation2] sm:$0x1]  ;;  %p1049_p10 = scmp.ne.s32.totalorder %s874_s8, %s1048_s9  ;;  %p1053_p11 = scmp.lt.s32.totalorder %s874_s8, %s874_s8 }
 0x17f   :  { %702 = vmatprep.subr.bf16.mxu1 %v481_v59  ;;  %p1054_p12 = scmp.lt.s32.totalorder %s1052_s25, %s1048_s9 }
 0x181   :  { %p1055_p13 = por %p1054_p12, %p1053_p11 }
 0x183   :  { %934 = vmatpush1.bf16.xpose.msra.mxu0 %v933_v57  ;;  %p1056_p0 = pnand %p1055_p13, %p1049_p10 }
 0x184   :  { %898 = vmatprep.subr.mxu0 %v1085_v42 }
 0x186   :  { %703 = vmatpush1.bf16.xpose.msra.mxu1 %v480_v16 }
 0x187   :  { %704 = vmatprep.subr.bf16.mxu1 %v485_v7 }
 0x18a   :  { %647 = vmatmul.mubr.f32.vlgmr.msra.gmra.mrb[4].mxu0 %v503_v61 }
 0x18b   :  { %900 = vmatprep.mubr.msk.f32.mxu0 %vm1086_vm5, %v1085_v42 }
 0x18e   :  { %705 = vmatpush1.bf16.xpose.msra.mxu1 %v484_v56 }
 0x18f   :  { %706 = vmatprep.subr.bf16.mxu1 %v489_v63 }
 0x196   :  { %707 = vmatpush1.bf16.xpose.msra.mxu1 %v488_v21 }
 0x19d   :  { %733 = vmatmul.mubr.bf16.vlgmr.msra.gmra.mrb[4].mxu1 %v654_v22 }
 0x25d   :  { %v648_v40 = vpop.f32.mrb[4].mxu0 }
 0x25e   :  { %v650_v3 = vpop.f32.mrb[5].mxu0  ;;  %v935_v25 = vadd.f32 %v648_v40, %v490_v24 }
 0x260   :  { %v659_v5 = vrot.slane %v935_v25, %v1244_v41 }
 0x270   :  { %v734_v39 = vpop.f32.mrb[4].mxu1 }
 0x271   :  { %v936_v8 = vadd.f32 %v734_v39, %v659_v5  ;;  %v736_v10 = vpop.f32.mrb[5].mxu1 }
 0x272   :  { %v737_v9 = vpop.f32.mrb[6].mxu1 }
 0x273   :  { %vm740_vm6 = vcmp.gt.f32.partialorder %v936_v8, 0.0  ;;  %v741_v1 = vmul.f32 0.2, %v936_v8  ;;  %v738_v11 = vpop.f32.mrb[7].mxu1 }
 0x275   :  { %v742_v14 = vsel %vm740_vm6, %v936_v8, %v741_v1 }
 0x276   :  { %v744_v17 = vsel %vm743_vm7, %v742_v14, 0.0  ;;  %899 = vmatpush3.xpose.msk.msra.mxu0 %vm743_vm7, %v742_v14 }
 0x277   :  { %v745_v20 = vrot.slane %v744_v17, 4 }
 0x279   :  { %v746_v44 = vadd.f32 %v745_v20, %v744_v17 }
 0x27b   :  { %v747_v23 = vrot.slane %v746_v44, 2 }
 0x27d   :  { %v748_v27 = vadd.f32 %v747_v23, %v746_v44 }
 0x27f   :  { %v749_v28 = vrot.slane %v748_v27, 1 }
 0x281   :  { %v750_v26 = vadd.f32 %v749_v28, %v748_v27 }
 0x283   :  { %v751_v41 = vmul.f32 0.125, %v750_v26 }
 0x285   :  { %v752_v29 = vsub.f32 %v742_v14, %v751_v41 }
 0x287   :  { %v753_v30 = vmul.f32 %v752_v29, %v752_v29 }
 0x289   :  { %v754_v31 = vsel %vm743_vm7, %v753_v30, 0.0 }
 0x28a   :  { %v755_v6 = vrot.slane %v754_v31, 4 }
 0x28c   :  { %v756_v32 = vadd.f32 %v755_v6, %v754_v31 }
 0x28e   :  { %v757_v45 = vrot.slane %v756_v32, 2 }
 0x290   :  { %v758_v38 = vadd.f32 %v757_v45, %v756_v32 }
 0x292   :  { %v759_v43 = vrot.slane %v758_v38, 1 }
 0x294   :  { %v760_v46 = vadd.f32 %v759_v43, %v758_v38 }
 0x296   :  { %v761_v47 = vmul.f32 0.125, %v760_v46 }
 0x298   :  { %v764_v48 = vadd.f32 1e-05, %v761_v47 }
 0x29a   :  { %976 = vrsqrt.f32 %v764_v48 }
 0x2a4   :  { %v977_v34 = vpop.eup %976 }
 0x2a5   :  { %v766_v49 = vmul.f32 %v977_v34, %v762_v33 }
 0x2a7   :  { %v770_v51 = vmul.f32 %v769_v35, %v766_v49  ;;  %v767_v36 = vmul.f32 %v766_v49, %v751_v41 }
 0x2a9   :  { %901 = vmatmul.mubr.msk.f32.vlgmr.msra.gmra.mrb[6].mxu0 %vm743_vm7, %v770_v51  ;;  %v768_v37 = vsub.f32 %v763_v50, %v767_v36 }
 0x2ab   :  { %v771_v52 = vmul.f32 %v769_v35, %v768_v37 }
 0x2ad   :  { %v773_v53 = vsel %vm772_vm8, %v771_v52, 0.0 }
 0x2ae   :  { %774 = vadd.xlane.f32.xlu0 %v773_v53 }
 0x33b   :  { %v775_v59 = vpop.xlane.xlu0 %774 }
 0x33c   :  { %v777_v55 = vadd.f32 %v776_v58, %v775_v59 }
 0x33e   :  { %780 = vperm.xlu0 %955, %v777_v55  }
 0x37c   :  { %v855_v60 = vpop.f32.mrb[6].mxu0 }
 0x37d   :  { %v902_v57 = vpop.f32.mrb[7].mxu0 }
 0x3bd   :  { %v781_v12 = vpop.permute.xlu0 %780 }
 0x3be   :  { %v856_v13 = vadd.f32 %v855_v60, %v781_v12 }
 0x3c0   :  { %v895_v0 = vmul.f32 -1.442695, %v856_v13 }
 0x3c2   :  { %978 = vpow2.f32 %v895_v0 }
 0x3cc   :  { %v979_v15 = vpop.eup %978 }
 0x3cd   :  { %v862_v16 = vadd.f32 1.0, %v979_v15 }
 0x3cf   :  { %980 = vrcp.f32 %v862_v16 }
 0x3d9   :  { %v981_v7 = vpop.eup %980 }
 0x3da   :  { %866 = vst.msk [vmem:[#allocation9] sm:$0x1] %vm865_vm9, %v981_v7 }
 0x3db   :  { %1059 = shalt.err (!%p1056_p0)
}
 0x3dc   :  { %s1060_s10 = scalar_lea.hbm %s1400_s11, 16 }
 0x3dd   :  { %p1061_p1 = scmp.ne.s32.totalorder %s1400_s11, %s1060_s10  ;;  %p1064_p2 = scmp.lt.u32.totalorder %s1060_s10, %s1400_s11 }
 0x3df   :  { %p1066_p3 = pnand %p1064_p2, %p1061_p1 }
 0x3e1   :  { %1069 = shalt.err (!%p1066_p3)
}
 0x3e2   :  { %876 = dma.vmem_to_hbm [thread:$0]  %s874_s8, 16, %s1400_s11, [#allocation5]  }
 0x3e3   :  { %1074 = dma.done.wait [#allocation5], 16  }
 0x3e4   :  { %1075 = vsyncadd [#allocation5], 4294967280 }
 0x3e5   :  { %880 = vsyncpa [#allocation4], 1 }
 0x3e6   :  { %881 = vsyncpa [#allocation7], 1 }
 0x3e7   :  { %882 = vsyncpa [#allocation5], 1 }

</bundles_post_ra>
